<compile_context>
chip_gen: v5e
topology: v5e:2x2
jax: 0.10.0
libtpu: 0.0.40
codegen_flags: <defaults>
</compile_context>

<pallas_src>
import jax
import jax.numpy as jnp
from jax import lax
from jax.experimental import pallas as pl
from jax.experimental.pallas import tpu as pltpu


# ----------------------------- Pallas kernel ---------------------------------

def inception_kernel(x_ref, mask_ref, w1_ref, w2_ref, vec_ref, o_ref):
    # x_ref   : (1, Cin, SP)   zero-padded input slab for this chunk (lane s <-> body pos s-3)
    # mask_ref: (1, S1)        1.0 on valid (non-padding) sequence positions, else 0.0
    # w1_ref  : (co, 3*Cin)    fused stage-1 weights (taps -1,0,+1), BN folded
    # w2_ref  : (co, 10*c4)    fused stage-2 weights (taps -2..+2), BN folded
    # vec_ref : (co, 3)        columns = [stage-1 bias | stage-2 bias | branch1/4 mask]
    # o_ref   : (1, co, S2)    [y1; y2; y3; y4] channel rows, lane-dense output
    co, S2 = o_ref.shape[1], o_ref.shape[2]
    c4 = co // 4
    S1 = S2 + 4
    x = x_ref[0]                                                    # (Cin, SP)

    # ---- stage 1: branch1 1x1, branch2 1x1, branch3 k3, branch4 k3 in ONE matmul.
    # im2col = sublane-stack of 3 lane-shifted views of x (XLU work only).
    xim = jnp.concatenate([x[:, j:j + S1] for j in range(3)], axis=0)   # (3*Cin, S1)
    z = jnp.dot(w1_ref[...], xim, preferred_element_type=jnp.float32)
    z = z + vec_ref[:, 0:1]                                             # (co, S1)

    # ---- mid activations of branch2/3 (mid BN folded), zeroed on padding columns
    # so the stage-2 convs see true zero padding.
    t = jnp.maximum(z[c4:3 * c4, :], 0.0) * mask_ref[...]               # (2*c4, S1)
    t = t.astype(w2_ref.dtype)

    # ---- stage 2: branch2 k3 and branch3 k5 fused in ONE matmul (zero weight cols).
    tim = jnp.concatenate([t[:, j:j + S2] for j in range(5)], axis=0)   # (10*c4, S2)
    y = jnp.dot(w2_ref[...], tim, preferred_element_type=jnp.float32)   # (co, S2)

    # ---- combine branches (no concat), final BN folded, ReLU, lane-dense store.
    out = z[:, 2:2 + S2] * vec_ref[:, 2:3] + vec_ref[:, 1:2] + y
    o_ref[0] = jnp.maximum(out, 0.0).astype(o_ref.dtype)


# ----------------------------- wrapper / glue ---------------------------------

EPS = 1e-5


def _bn_affine(gamma, beta, mean, var):
    scale = gamma / jnp.sqrt(var + EPS)
    shift = beta - mean * scale
    return scale, shift


def _round_up(v, m):
    return (v + m - 1) // m * m


def _pick_num_chunks(N, Lp):
    """Largest divisor of N keeping >= MIN_ROWS sequence rows per chunk."""
    MIN_ROWS = 2048          # amortize ~0.35us/grid-step, keep DMA/compute overlap
    best = 1
    for c in range(1, N + 1):
        if N % c == 0 and (N // c) * Lp >= MIN_ROWS:
            best = c
    return best


def _fold_params(P, compute_dtype):
    """Fold eval-mode BN + conv biases into 2 fused (co, K) weight mats + (co,3) vec."""
    c4, cin = P['w1'].shape[0], P['w1'].shape[1]
    s2, h2 = _bn_affine(*P['bn2'])
    s3, h3 = _bn_affine(*P['bn3'])
    sF, hF = _bn_affine(*P['bnF'])
    sF1, sF2, sF3, sF4 = jnp.split(sF, 4)
    hF1, hF2, hF3, hF4 = jnp.split(hF, 4)

    w1 = P['w1'][:, :, 0] * sF1[:, None]             # (c4, Cin)   final BN folded
    w2a = P['w2a'][:, :, 0] * s2[:, None]            # (c4, Cin)   mid BN folded
    w3a = P['w3a'] * s3[:, None, None]               # (c4, Cin, 3)
    w4 = P['w4'] * sF4[:, None, None]                # (c4, Cin, 3)
    zci = jnp.zeros((c4, cin), jnp.float32)
    w1t = jnp.concatenate(
        [jnp.concatenate([w1 if j == 1 else zci,
                          w2a if j == 1 else zci,
                          w3a[:, :, j],
                          w4[:, :, j]], axis=0) for j in range(3)],
        axis=1)                                       # (co, 3*Cin), tap-major cols

    w2b = P['w2b'] * sF2[:, None, None]              # (c4, c4, 3)
    w3b = P['w3b'] * sF3[:, None, None]              # (c4, c4, 5)
    zcc = jnp.zeros((c4, c4), jnp.float32)
    cols = []
    for j in range(5):                               # tap offset d = j - 2
        from_t2 = jnp.concatenate(
            [zcc, w2b[:, :, j - 1] if 1 <= j <= 3 else zcc, zcc, zcc], axis=0)
        from_t3 = jnp.concatenate([zcc, zcc, w3b[:, :, j], zcc], axis=0)
        cols.append(jnp.concatenate([from_t2, from_t3], axis=1))     # (co, 2*c4)
    w2t = jnp.concatenate(cols, axis=1)               # (co, 10*c4)

    bias1 = jnp.concatenate([P['b1'] * sF1 + hF1,
                             P['b2a'] * s2 + h2,
                             P['b3a'] * s3 + h3,
                             P['b4'] * sF4 + hF4])
    bias2 = jnp.concatenate([jnp.zeros((c4,), jnp.float32),
                             P['b2b'] * sF2 + hF2,
                             P['b3b'] * sF3 + hF3,
                             jnp.zeros((c4,), jnp.float32)])
    bmask = jnp.concatenate([jnp.ones((c4,), jnp.float32),
                             jnp.zeros((2 * c4,), jnp.float32),
                             jnp.ones((c4,), jnp.float32)])
    vec = jnp.stack([bias1, bias2, bmask], axis=1).astype(jnp.float32)  # (co, 3)
    return w1t.astype(compute_dtype), w2t.astype(compute_dtype), vec


def inception_forward(x_ncl, P, num_chunks=None, compute_dtype=jnp.float32):
    """x_ncl: (N, Cin, L) float32, PyTorch NCL layout. Returns (N, co, L) float32."""
    N, Cin, L = x_ncl.shape
    co = P['bnF'][0].shape[0]
    assert co % 4 == 0
    Lp = L + 4                                   # per-sample 2-row zero halo each side
    if num_chunks is None:
        num_chunks = _pick_num_chunks(N, Lp)
    assert N % num_chunks == 0
    Nb = N // num_chunks
    body = Nb * Lp                               # sequence rows per chunk
    S2 = _round_up(body, 128)                    # lane-dense output width (unmasked vst)
    S1 = S2 + 4                                  # stage-1 / mid-activation width
    SP = S2 + 6                                  # input slab width

    w1t, w2t, vec = _fold_params(P, compute_dtype)

    # ---- zero-padded (Cin, SP) input slab per chunk: lane s <-> body position s-3
    x = x_ncl.astype(compute_dtype).reshape(num_chunks, Nb, Cin, L)
    x = jnp.pad(x, ((0, 0), (0, 0), (0, 0), (2, 2)))             # per-sample halo
    x = jnp.transpose(x, (0, 2, 1, 3)).reshape(num_chunks, Cin, body)
    x = jnp.pad(x, ((0, 0), (0, 0), (3, SP - 3 - body)))         # margins + 128-round

    # ---- lane-dense validity mask on the stage-1 domain (lane r <-> body pos r-2)
    rel = jnp.arange(S1) - 2
    local = rel % Lp
    valid = (rel >= 0) & (rel < body) & (local >= 2) & (local < L + 2)
    mask = valid.astype(jnp.float32)[None, :]                    # (1, S1)

    # Per-chunk VMEM footprint is ~1.3 KB per sequence row in f32 (all slabs,
    # double buffers included), so with <= 8192-row chunks we stay far below the
    # 32 MiB scoped default on every generation (incl. v7x's 64 MiB physical).
    out = pl.pallas_call(
        inception_kernel,
        out_shape=jax.ShapeDtypeStruct((num_chunks, co, S2), jnp.float32),
        grid_spec=pltpu.PrefetchScalarGridSpec(
            num_scalar_prefetch=0,
            grid=(num_chunks,),
            in_specs=[
                pl.BlockSpec((1, Cin, SP), lambda g: (g, 0, 0)),
                pl.BlockSpec((1, S1), lambda g: (0, 0)),
                pl.BlockSpec(w1t.shape, lambda g: (0, 0)),
                pl.BlockSpec(w2t.shape, lambda g: (0, 0)),
                pl.BlockSpec(vec.shape, lambda g: (0, 0)),
            ],
            out_specs=pl.BlockSpec((1, co, S2), lambda g: (g, 0, 0)),
        ),
        compiler_params=pltpu.CompilerParams(
            dimension_semantics=("parallel",)),
    )(x, mask, w1t, w2t, vec)

    # strip the 128-rounding and the per-sample halo, back to (N, co, L)
    out = out[:, :, :body].reshape(num_chunks, co, Nb, Lp)
    out = jnp.transpose(out, (0, 2, 1, 3)).reshape(N, co, Lp)
    return out[:, :, 2:L + 2]


# ----------------------------- pure-JAX reference ------------------------------

def ref_forward(x, P):
    def conv1d(x, w, b, pad):
        y = lax.conv_general_dilated(x, w, window_strides=(1,),
                                     padding=[(pad, pad)],
                                     dimension_numbers=('NCH', 'OIH', 'NCH'))
        return y + b[None, :, None]

    def bn(x, gamma, beta, mean, var):
        s, h = _bn_affine(gamma, beta, mean, var)
        return x * s[None, :, None] + h[None, :, None]

    b1 = conv1d(x, P['w1'], P['b1'], 0)
    b2 = conv1d(x, P['w2a'], P['b2a'], 0)
    b2 = jax.nn.relu(bn(b2, *P['bn2']))
    b2 = conv1d(b2, P['w2b'], P['b2b'], 1)
    b3 = conv1d(x, P['w3a'], P['b3a'], 1)
    b3 = jax.nn.relu(bn(b3, *P['bn3']))
    b3 = conv1d(b3, P['w3b'], P['b3b'], 2)
    b4 = conv1d(x, P['w4'], P['b4'], 1)
    y = jnp.concatenate([b1, b2, b3, b4], axis=1)
    return jax.nn.relu(bn(y, *P['bnF']))


# ----------------------------- parameter init ----------------------------------

def init_params(key, cin, co):
    assert co % 4 == 0
    c4 = co // 4
    keys = iter(jax.random.split(key, 40))

    def conv_w(cout, cinn, k):
        return 0.1 * jax.random.normal(next(keys), (cout, cinn, k), jnp.float32)

    def bias(c):
        return 0.1 * jax.random.normal(next(keys), (c,), jnp.float32)

    def bn(c):
        gamma = 0.5 + jax.random.uniform(next(keys), (c,), jnp.float32)
        beta = 0.1 * jax.random.normal(next(keys), (c,), jnp.float32)
        mean = 0.1 * jax.random.normal(next(keys), (c,), jnp.float32)
        var = 0.5 + jax.random.uniform(next(keys), (c,), jnp.float32)
        return (gamma, beta, mean, var)

    return {
        'w1': conv_w(c4, cin, 1), 'b1': bias(c4),
        'w2a': conv_w(c4, cin, 1), 'b2a': bias(c4), 'bn2': bn(c4),
        'w2b': conv_w(c4, c4, 3), 'b2b': bias(c4),
        'w3a': conv_w(c4, cin, 3), 'b3a': bias(c4), 'bn3': bn(c4),
        'w3b': conv_w(c4, c4, 5), 'b3b': bias(c4),
        'w4': conv_w(c4, cin, 3), 'b4': bias(c4),
        'bnF': bn(co),
    }


# ----------------------------- main --------------------------------------------

if __name__ == "__main__":
    root = jax.random.PRNGKey(0)
    k_x, k_x2, k_p = jax.random.split(root, 3)

    N, Cin, L, co = 2, 16, 64, 32
    x = jax.random.normal(k_x, (N, Cin, L), jnp.float32)
    params = init_params(k_p, Cin, co)
    ref = ref_forward(x, params)

    # f32 path, single chunk (auto-chunking picks 1 at this tiny size)
    out = jax.block_until_ready(inception_forward(x, params))
    assert out.shape == (N, co, L), out.shape
    err = float(jnp.max(jnp.abs(out - ref)))
    assert jnp.allclose(out, ref, atol=1e-4, rtol=1e-4), err

    # multi-chunk grid + odd L: exercises the halo/mask bookkeeping across >1 steps
    N2, L2 = 4, 37
    x2 = jax.random.normal(k_x2, (N2, Cin, L2), jnp.float32)
    ref2 = ref_forward(x2, params)
    out2 = jax.block_until_ready(inception_forward(x2, params, num_chunks=2))
    err2 = float(jnp.max(jnp.abs(out2 - ref2)))
    assert out2.shape == (N2, co, L2), out2.shape
    assert jnp.allclose(out2, ref2, atol=1e-4, rtol=1e-4), err2

    # bf16-operand / f32-accumulate path (native MXU rate on v6e/v7x); loose check
    out_bf = jax.block_until_ready(
        inception_forward(x, params, compute_dtype=jnp.bfloat16))
    err_bf = float(jnp.max(jnp.abs(out_bf - ref)))
    assert err_bf < 0.2, err_bf

    print("KERNEL_OK")
</pallas_src>

<mosaic_0001>
module attributes {stable_mosaic.version = 11 : i64} {
  func.func @inception_kernel(%arg0: i32, %arg1: memref<1x16x262xf32, #tpu.memory_space<vmem>>, %arg2: memref<1x260xf32, #tpu.memory_space<vmem>>, %arg3: memref<32x48xf32, #tpu.memory_space<vmem>>, %arg4: memref<32x80xf32, #tpu.memory_space<vmem>>, %arg5: memref<32x3xf32, #tpu.memory_space<vmem>>, %arg6: memref<1x32x256xf32, #tpu.memory_space<vmem>>) attributes {dimension_semantics = [#tpu.dimension_semantics<parallel>], iteration_bounds = array<i64: 1>, scalar_prefetch = 0 : i64, scratch_operands = 0 : i64, tpu.core_type = #tpu.core_type<tc>, window_params = [{transform_indices = @transform_0, window_bounds = array<i64: 1, 16, 262>}, {pipeline_mode = #tpu.pipeline_mode<synchronous>, transform_indices = @transform_1, window_bounds = array<i64: 1, 260>}, {pipeline_mode = #tpu.pipeline_mode<synchronous>, transform_indices = @transform_2, window_bounds = array<i64: 32, 48>}, {pipeline_mode = #tpu.pipeline_mode<synchronous>, transform_indices = @transform_3, window_bounds = array<i64: 32, 80>}, {pipeline_mode = #tpu.pipeline_mode<synchronous>, transform_indices = @transform_4, window_bounds = array<i64: 32, 3>}, {transform_indices = @transform_5, window_bounds = array<i64: 1, 32, 256>}]} {
    %c0 = arith.constant 0 : index
    %c0_0 = arith.constant 0 : index
    %c0_1 = arith.constant 0 : index
    %0 = vector.load %arg1[%c0, %c0_0, %c0_1] : memref<1x16x262xf32, #tpu.memory_space<vmem>>, vector<1x16x262xf32>
    %1 = vector.shape_cast %0 : vector<1x16x262xf32> to vector<16x262xf32>
    %2 = vector.extract_strided_slice %1 {offsets = [0, 0], sizes = [16, 260], strides = [1, 1]} : vector<16x262xf32> to vector<16x260xf32>
    %3 = vector.extract_strided_slice %1 {offsets = [0, 1], sizes = [16, 260], strides = [1, 1]} : vector<16x262xf32> to vector<16x260xf32>
    %4 = vector.extract_strided_slice %1 {offsets = [0, 2], sizes = [16, 260], strides = [1, 1]} : vector<16x262xf32> to vector<16x260xf32>
    %5 = tpu.concatenate %2, %3, %4 in 0 : vector<16x260xf32>, vector<16x260xf32>, vector<16x260xf32> -> vector<48x260xf32>
    %c0_2 = arith.constant 0 : index
    %c0_3 = arith.constant 0 : index
    %6 = vector.load %arg3[%c0_2, %c0_3] : memref<32x48xf32, #tpu.memory_space<vmem>>, vector<32x48xf32>
    %cst = arith.constant dense<0.000000e+00> : vector<32x260xf32>
    %7 = tpu.matmul %6, %5, %cst {dimension_numbers = #tpu.dot_dimension_numbers<[1], [0], [0], [1], [0, 0, 1, 1], [], []>} : vector<32x48xf32>, vector<48x260xf32>, vector<32x260xf32> -> vector<32x260xf32>
    %c0_4 = arith.constant 0 : index
    %c0_5 = arith.constant 0 : index
    %8 = vector.load %arg5[%c0_4, %c0_5] : memref<32x3xf32, #tpu.memory_space<vmem>>, vector<32x1xf32>
    %9 = vector.broadcast %8 : vector<32x1xf32> to vector<32x260xf32>
    %10 = arith.addf %7, %9 : vector<32x260xf32>
    %11 = vector.extract_strided_slice %10 {offsets = [8, 0], sizes = [16, 260], strides = [1, 1]} : vector<32x260xf32> to vector<16x260xf32>
    %cst_6 = arith.constant 0.000000e+00 : f32
    %12 = vector.broadcast %cst_6 : f32 to vector<16x260xf32>
    %13 = arith.maximumf %11, %12 : vector<16x260xf32>
    %c0_7 = arith.constant 0 : index
    %c0_8 = arith.constant 0 : index
    %14 = vector.load %arg2[%c0_7, %c0_8] : memref<1x260xf32, #tpu.memory_space<vmem>>, vector<1x260xf32>
    %15 = vector.broadcast %14 : vector<1x260xf32> to vector<16x260xf32>
    %16 = arith.mulf %13, %15 : vector<16x260xf32>
    %17 = vector.extract_strided_slice %16 {offsets = [0, 0], sizes = [16, 256], strides = [1, 1]} : vector<16x260xf32> to vector<16x256xf32>
    %18 = vector.extract_strided_slice %16 {offsets = [0, 1], sizes = [16, 256], strides = [1, 1]} : vector<16x260xf32> to vector<16x256xf32>
    %19 = vector.extract_strided_slice %16 {offsets = [0, 2], sizes = [16, 256], strides = [1, 1]} : vector<16x260xf32> to vector<16x256xf32>
    %20 = vector.extract_strided_slice %16 {offsets = [0, 3], sizes = [16, 256], strides = [1, 1]} : vector<16x260xf32> to vector<16x256xf32>
    %21 = vector.extract_strided_slice %16 {offsets = [0, 4], sizes = [16, 256], strides = [1, 1]} : vector<16x260xf32> to vector<16x256xf32>
    %22 = tpu.concatenate %17, %18, %19, %20, %21 in 0 : vector<16x256xf32>, vector<16x256xf32>, vector<16x256xf32>, vector<16x256xf32>, vector<16x256xf32> -> vector<80x256xf32>
    %c0_9 = arith.constant 0 : index
    %c0_10 = arith.constant 0 : index
    %23 = vector.load %arg4[%c0_9, %c0_10] : memref<32x80xf32, #tpu.memory_space<vmem>>, vector<32x80xf32>
    %cst_11 = arith.constant dense<0.000000e+00> : vector<32x256xf32>
    %24 = tpu.matmul %23, %22, %cst_11 {dimension_numbers = #tpu.dot_dimension_numbers<[1], [0], [0], [1], [0, 0, 1, 1], [], []>} : vector<32x80xf32>, vector<80x256xf32>, vector<32x256xf32> -> vector<32x256xf32>
    %25 = vector.extract_strided_slice %10 {offsets = [0, 2], sizes = [32, 256], strides = [1, 1]} : vector<32x260xf32> to vector<32x256xf32>
    %c0_12 = arith.constant 0 : index
    %c2 = arith.constant 2 : index
    %26 = vector.load %arg5[%c0_12, %c2] : memref<32x3xf32, #tpu.memory_space<vmem>>, vector<32x1xf32>
    %27 = vector.broadcast %26 : vector<32x1xf32> to vector<32x256xf32>
    %28 = arith.mulf %25, %27 : vector<32x256xf32>
    %c0_13 = arith.constant 0 : index
    %c1 = arith.constant 1 : index
    %29 = vector.load %arg5[%c0_13, %c1] : memref<32x3xf32, #tpu.memory_space<vmem>>, vector<32x1xf32>
    %30 = vector.broadcast %29 : vector<32x1xf32> to vector<32x256xf32>
    %31 = arith.addf %28, %30 : vector<32x256xf32>
    %32 = arith.addf %31, %24 : vector<32x256xf32>
    %cst_14 = arith.constant 0.000000e+00 : f32
    %33 = vector.broadcast %cst_14 : f32 to vector<32x256xf32>
    %34 = arith.maximumf %32, %33 : vector<32x256xf32>
    %c0_15 = arith.constant 0 : index
    %c0_16 = arith.constant 0 : index
    %c0_17 = arith.constant 0 : index
    %35 = vector.load %arg6[%c0_15, %c0_16, %c0_17] : memref<1x32x256xf32, #tpu.memory_space<vmem>>, vector<1x32x256xf32>
    %36 = vector.shape_cast %35 : vector<1x32x256xf32> to vector<32x256xf32>
    %37 = vector.shape_cast %34 : vector<32x256xf32> to vector<1x32x256xf32>
    tpu.vector_store %arg6[%c0_15, %c0_16, %c0_17], %37 {strides = array<i32>} : memref<1x32x256xf32, #tpu.memory_space<vmem>>, vector<1x32x256xf32>,
    return
  }
  func.func @transform_0(%arg0: i32) -> (i32, i32, i32) {
    %c0_i32 = arith.constant 0 : i32
    %c0_i32_0 = arith.constant 0 : i32
    %c0_i32_1 = arith.constant 0 : i32
    return %arg0, %c0_i32, %c0_i32_0 : i32, i32, i32
  }
  func.func @transform_1(%arg0: i32) -> (i32, i32) {
    %c0_i32 = arith.constant 0 : i32
    %c0_i32_0 = arith.constant 0 : i32
    %c0_i32_1 = arith.constant 0 : i32
    return %c0_i32, %c0_i32_0 : i32, i32
  }
  func.func @transform_2(%arg0: i32) -> (i32, i32) {
    %c0_i32 = arith.constant 0 : i32
    %c0_i32_0 = arith.constant 0 : i32
    %c0_i32_1 = arith.constant 0 : i32
    return %c0_i32, %c0_i32_0 : i32, i32
  }
  func.func @transform_3(%arg0: i32) -> (i32, i32) {
    %c0_i32 = arith.constant 0 : i32
    %c0_i32_0 = arith.constant 0 : i32
    %c0_i32_1 = arith.constant 0 : i32
    return %c0_i32, %c0_i32_0 : i32, i32
  }
  func.func @transform_4(%arg0: i32) -> (i32, i32) {
    %c0_i32 = arith.constant 0 : i32
    %c0_i32_0 = arith.constant 0 : i32
    %c0_i32_1 = arith.constant 0 : i32
    return %c0_i32, %c0_i32_0 : i32, i32
  }
  func.func @transform_5(%arg0: i32) -> (i32, i32, i32) {
    %c0_i32 = arith.constant 0 : i32
    %c0_i32_0 = arith.constant 0 : i32
    %c0_i32_1 = arith.constant 0 : i32
    return %arg0, %c0_i32, %c0_i32_0 : i32, i32, i32
  }
}

</mosaic_0001>

<bundles_post_ra>
// kernel: tpu_custom_call.1
= control target key start
LH: loop header
LB: loop body
LE: loop exit
PB: predicated region body
PF: predicated region fallthrough
CT: control target
= control target key end

     0   :  { %10 = vsyncpa [#allocation3], 0  ;;  %s1134_s0 = inlined_call_operand.hbm [shape: f32[1,16,262], index: 0, kind: input, shape index: {}]   ;;  %s1135_s1 = inlined_call_operand.vmem [shape: f32[1,260], index: 1, kind: input, shape index: {}]   ;;  %s1136_s2 = inlined_call_operand.vmem [shape: f32[32,48], index: 2, kind: input, shape index: {}]   ;;  %s1137_s3 = inlined_call_operand.hbm [shape: f32[32,80], index: 3, kind: input, shape index: {}]   ;;  %s1138_s4 = inlined_call_operand.vmem [shape: f32[32,3], index: 4, kind: input, shape index: {}]   ;;  %s1139_s5 = inlined_call_operand.hbm [shape: f32[1,32,256], index: 5, kind: output, shape index: {}]  }
   0x1   :  { %11 = vsyncpa [#allocation6], 0 }
   0x2   :  { %12 = vsyncpa [#allocation4], 0  ;;  %s17_s20 = sshll.u32 %s1134_s0, 4  ;;  %s856_s21 = smov [#allocation2]   ;;  %s18_s20 = int_to_ptr.hbm [resolvable:$true] %s17_s20 }
   0x3   :  { %s19_s22 = sshll.u32 %s856_s21, 4  ;;  %s34_s25 = sshll.u32 %s1137_s3, 4  ;;  %s20_s22 = int_to_ptr.vmem [resolvable:$true] %s19_s22  ;;  %s35_s25 = int_to_ptr.hbm [resolvable:$true] %s34_s25 }
   0x4   :  { %s857_s26 = smov 384   ;;  %s858_s27 = smov 24  }
   0x5   :  { %25 = dma.hbm_to_vmem [thread:$0]  %s18_s20, 768, %s20_s22, [#allocation3], %s857_s26, %s857_s26, %s858_s27  }
   0x6   :  { %s859_s28 = smov [#allocation5]   ;;  %s860_s30 = smov 128  }
   0x7   :  { %s36_s29 = sshll.u32 %s859_s28, 4  ;;  %s861_s6 = smov 8   ;;  %s37_s29 = int_to_ptr.vmem [resolvable:$true] %s36_s29 }
   0x8   :  { %42 = dma.hbm_to_vmem [thread:$0]  %s35_s25, 512, %s37_s29, [#allocation6], %s860_s30, %s860_s30, %s861_s6  }
   0x9   :  { %850 = dma.done.wait [#allocation3], 768  }
   0xa   :  { %851 = vsyncadd [#allocation3], 4294966528 }
   0xb   :  { %852 = dma.done.wait [#allocation6], 512  }
   0xc   :  { %853 = vsyncadd [#allocation6], 4294966784  ;;  %v909_v0 = vld [vmem:[#allocation2 + $0x18] sm:$0xff]  ;;  %v911_v1 = vld [vmem:[#allocation2 + $0x20] sm:$0xff]  ;;  %s862_s0 = smov 126   ;;  %s863_s3 = smov 127  }
   0xd   :  { %v913_v2 = vld [vmem:[#allocation2 + $0x8] sm:$0xff]  ;;  %v680_v3 = vpack.i.bf16 %v911_v1, %v909_v0  ;;  %v917_v4 = vld [vmem:[#allocation2 + $0x10] sm:$0xff]  ;;  %v919_v5 = vld [vmem:[#allocation2] sm:$0xff]  ;;  %vm100_vm0 = vcmask 1031168   ;;  %v864_v19 = vmov 0   ;;  %vm77_vm1 = vcmask 1039360  }
   0xe   :  { %v58_v6 = vld [vmem:[#allocation2 + $0x28] sm:$0xff]  ;;  %v690_v7 = vpack.i.bf16 %v917_v4, %v913_v2  ;;  %v939_v16 = vld [vmem:[%s1138_s4 + $0x10] sm:$0xff]  ;;  %711 = vset.pattern.permute.xlu1 %v864_v19  ;;  %710 = vset.pattern.permute.xlu0 %v864_v19  ;;  %v111_v38 = vld [vmem:[%s1136_s2] sm:$0xff]  ;;  %vm139_vm2 = vcmask 392192   ;;  %v868_v19 = vmov 1   ;;  %vm338_vm3 = vcmask 1014784  }
   0xf   :  { %v700_v8 = vpack.i.bf16 %v919_v5, %v58_v6  ;;  %681 = vrot.lane.b32.xlu0 %v680_v3, %s862_s0  ;;  %v934_v15 = vld [vmem:[%s1138_s4 + $0x8] sm:$0xff]  ;;  %v113_v40 = vld [vmem:[%s1136_s2 + $0x10] sm:$0xff]  ;;  %v114_v41 = vld [vmem:[%s1136_s2 + $0x18] sm:$0xff]  ;;  %vm317_vm4 = vcmask 1022976   ;;  %vm351_vm5 = vcmask 654336   ;;  %vm502_vm6 = vcmask 15360  }
  0x10   :  { %691 = vrot.lane.b32.xlu1 %v690_v7, %s862_s0  ;;  %v112_v39 = vld [vmem:[%s1136_s2 + $0x8] sm:$0xff]  ;;  %v245_v45 = vld [vmem:[%s1135_s1] sm:$0x7]  ;;  %s865_s1 = smov 125   ;;  %s866_s2 = smov 124  }
  0x11   :  { %701 = vrot.lane.b32.xlu2 %v700_v8, %s863_s3  ;;  %v247_v49 = vperm.slane %v245_v45, 0  ;;  %v248_v53 = vperm.slane %v245_v45, 1  ;;  %s870_s25 = smov [#allocation7]   ;;  %s609_s29 = sshll.u32 %s1139_s5, 4  ;;  %s610_s29 = int_to_ptr.hbm [resolvable:$true] %s609_s29 }
  0x12   :  { %s607_s26 = sshll.u32 %s870_s25, 4  ;;  %s871_s30 = smov 256   ;;  %s608_s26 = int_to_ptr.vmem [resolvable:$true] %s607_s26 }
  0x13   :  { %s872_s6 = smov 16  }
  0x17   :  { %686 = vrot.lane.b32.xlu0 %v700_v8, %s862_s0 }
  0x18   :  { %696 = vrot.lane.b32.xlu1 %v680_v3, %s863_s3 }
  0x19   :  { %706 = vrot.lane.b32.xlu2 %v690_v7, %s863_s3 }
  0x1f   :  { %131 = vperm.xlu0 %710, %v939_v16  }
  0x20   :  { %126 = vperm.xlu1 %711, %v934_v15  }
  0x6b   :  { %v702_v9 = vpop.permute.xlu2 %701 }
  0x6c   :  { %v704_v25 = vunpack.i.h.bf16 %v702_v9  ;;  %v703_v34 = vunpack.i.l.bf16 %v702_v9 }
  0x73   :  { %v707_v17 = vpop.permute.xlu2 %706 }
  0x74   :  { %v708_v28 = vunpack.i.l.bf16 %v707_v17  ;;  %v709_v31 = vunpack.i.h.bf16 %v707_v17  ;;  %v115_v17 = vld [vmem:[%s1138_s4] sm:$0xff] }
  0x76   :  { %v78_v35 = vsel %vm77_vm1, %v704_v25, %v708_v28  ;;  %v79_v37 = vsel %vm77_vm1, %v708_v28, %v709_v31 }
  0x81   :  { %v682_v10 = vpop.permute.xlu0 %681 }
  0x82   :  { %v684_v11 = vunpack.i.h.bf16 %v682_v10  ;;  %v683_v12 = vunpack.i.l.bf16 %v682_v10  ;;  %v692_v13 = vpop.permute.xlu1 %691 }
  0x83   :  { %v693_v20 = vunpack.i.l.bf16 %v692_v13  ;;  %v694_v24 = vunpack.i.h.bf16 %v692_v13 }
  0x84   :  { %v103_v14 = vsel %vm100_vm0, %v683_v12, %v684_v11 }
  0x85   :  { %162 = vmatpush.msra.mxu0 %v103_v14  ;;  %v102_v33 = vsel %vm100_vm0, %v693_v20, %v694_v24 }
  0x89   :  { %v687_v18 = vpop.permute.xlu0 %686 }
  0x8a   :  { %v697_v21 = vpop.permute.xlu1 %696  ;;  %v689_v22 = vunpack.i.h.bf16 %v687_v18  ;;  %v688_v23 = vunpack.i.l.bf16 %v687_v18  ;;  %v118_v18 = vld [vmem:[%s1138_s4 + $0x18] sm:$0xff]  ;;  %s869_s4 = smov 2  }
  0x8b   :  { %v699_v26 = vunpack.i.h.bf16 %v697_v21  ;;  %v698_v27 = vunpack.i.l.bf16 %v697_v21 }
  0x8c   :  { %220 = vmatpush.msra.mxu2 %v688_v23  ;;  %v101_v29 = vsel %vm100_vm0, %v689_v22, %v693_v20  ;;  %v104_v30 = vsel %vm100_vm0, %v684_v11, %v688_v23  ;;  %v249_v11 = vperm.slane %v245_v45, 2 }
  0x8d   :  { %163 = vmatpush.msra.mxu0 %v101_v29  ;;  %191 = vmatpush.msra.mxu1 %v104_v30  ;;  %v80_v32 = vsel %vm77_vm1, %v698_v27, %v699_v26  ;;  %v81_v36 = vsel %vm77_vm1, %v699_v26, %v703_v34 }
  0x8e   :  { %221 = vmatpush.msra.mxu2 %v694_v24 }
  0x8f   :  { %164 = vmatpush.msra.mxu0 %v80_v32  ;;  %192 = vmatpush.msra.mxu1 %v102_v33 }
  0x90   :  { %222 = vmatpush.msra.mxu2 %v703_v34 }
  0x91   :  { %165 = vmatpush.msra.mxu0 %v78_v35  ;;  %193 = vmatpush.msra.mxu1 %v81_v36  ;;  %v132_v56 = vpop.permute.xlu0 %131 }
  0x92   :  { %223 = vmatpush.msra.mxu2 %v709_v31  ;;  %v127_v44 = vpop.permute.xlu1 %126 }
  0x93   :  { %194 = vmatpush.msra.mxu1 %v79_v37  ;;  %166 = vmatpush.msra.mxu0 %v909_v0 }
  0x94   :  { %224 = vmatpush.msra.mxu2 %v58_v6 }
  0x95   :  { %195 = vmatpush.msra.mxu1 %v911_v1  ;;  %167 = vmatpush.msra.mxu0 %v919_v5  ;;  %v867_v1 = vmov 2  }
  0x96   :  { %225 = vmatpush.msra.mxu2 %v917_v4  ;;  %623 = vmatmul.msk.f32.vlgmr.msra.gmra.mxu0 %vm139_vm2, %v111_v38 }
  0x97   :  { %196 = vmatpush.msra.mxu1 %v913_v2  ;;  %631 = vmatmul.msk.f32.vlgmr.msra.gmra.mxu2 %vm139_vm2, %v111_v38 }
  0x98   :  { %627 = vmatmul.msk.f32.vlgmr.msra.gmra.mxu1 %vm139_vm2, %v111_v38  ;;  %772 = vset.pattern.permute.xlu2 %v867_v1 }
  0x9e   :  { %624 = vmatmul.msk.f32.gmra.mxu0 %vm139_vm2, %v112_v39 }
  0x9f   :  { %632 = vmatmul.msk.f32.gmra.mxu2 %vm139_vm2, %v112_v39 }
  0xa0   :  { %628 = vmatmul.msk.f32.gmra.mxu1 %vm139_vm2, %v112_v39 }
  0xa6   :  { %625 = vmatmul.msk.f32.gmra.mxu0 %vm139_vm2, %v113_v40 }
  0xa7   :  { %633 = vmatmul.msk.f32.gmra.mxu2 %vm139_vm2, %v113_v40 }
  0xa8   :  { %629 = vmatmul.msk.f32.gmra.mxu1 %vm139_vm2, %v113_v40 }
  0xae   :  { %626 = vmatmul.msk.f32.gmra.mxu0 %vm139_vm2, %v114_v41 }
  0xaf   :  { %634 = vmatmul.msk.f32.gmra.mxu2 %vm139_vm2, %v114_v41 }
  0xb0   :  { %630 = vmatmul.msk.f32.gmra.mxu1 %vm139_vm2, %v114_v41 }
 0x113   :  { %v979_v42 = vpop.f32.mrf.mxu0 }
 0x115   :  { %v981_v43 = vpop.f32.mrf.mxu1 }
 0x11a   :  { %v986_v46 = vpop.f32.mrf.mxu2 }
 0x11b   :  { %v172_v47 = vpop.f32.mrf.mxu0 }
 0x11c   :  { %v988_v48 = vadd.f32 %v172_v47, %v127_v44 }
 0x11d   :  { %v201_v50 = vpop.f32.mrf.mxu1 }
 0x11e   :  { %v239_v51 = vmax.f32 %v988_v48, 0.0  ;;  %v991_v52 = vadd.f32 %v201_v50, %v127_v44 }
 0x120   :  { %v993_v54 = vmul.f32 %v247_v49, %v239_v51  ;;  %v240_v55 = vmax.f32 %v991_v52, 0.0 }
 0x122   :  { %v996_v57 = vmul.f32 %v248_v53, %v240_v55  ;;  %v230_v58 = vpop.f32.mrf.mxu2 }
 0x123   :  { %v175_v59 = vpop.f32.mrf.mxu0  ;;  %v1008_v4 = vadd.f32 %v230_v58, %v127_v44 }
 0x124   :  { %v998_v60 = vadd.f32 %v175_v59, %v132_v56  ;;  %v717_v61 = vpack.i.bf16 %v996_v57, %v993_v54 }
 0x125   :  { %v204_v62 = vpop.f32.mrf.mxu1  ;;  %v241_v10 = vmax.f32 %v1008_v4, 0.0 }
 0x126   :  { %v242_v63 = vmax.f32 %v998_v60, 0.0  ;;  %v1003_v0 = vadd.f32 %v204_v62, %v132_v56  ;;  %718 = vrot.lane.b32.xlu0 %v717_v61, %s865_s1  ;;  %713 = vrot.lane.b32.xlu1 %v717_v61, %s866_s2 }
 0x127   :  { %v255_v13 = vmul.f32 %v249_v11, %v241_v10  ;;  %v347_v10 = vld [vmem:[#allocation5] sm:$0xff] }
 0x128   :  { %v1005_v2 = vmul.f32 %v247_v49, %v242_v63  ;;  %v243_v3 = vmax.f32 %v1003_v0, 0.0 }
 0x12a   :  { %v1010_v5 = vmul.f32 %v248_v53, %v243_v3  ;;  %v233_v6 = vpop.f32.mrf.mxu2 }
 0x12b   :  { %v1012_v7 = vadd.f32 %v233_v6, %v132_v56 }
 0x12c   :  { %v722_v8 = vpack.i.bf16 %v1010_v5, %v1005_v2 }
 0x12d   :  { %v244_v9 = vmax.f32 %v1012_v7, 0.0 }
 0x12e   :  { %723 = vrot.lane.b32.xlu2 %v722_v8, %s866_s2  ;;  %743 = vrot.lane.b32.xlu0 %v722_v8, %s863_s3 }
 0x12f   :  { %738 = vrot.lane.b32.xlu1 %v722_v8, %s862_s0  ;;  %v258_v12 = vmul.f32 %v249_v11, %v244_v9 }
 0x131   :  { %v757_v14 = vpack.i.bf16 %v255_v13, %v258_v12 }
 0x136   :  { %728 = vrot.lane.b32.xlu2 %v722_v8, %s865_s1  ;;  %758 = vrot.lane.b32.xlu0 %v757_v14, %s865_s1 }
 0x137   :  { %748 = vrot.lane.b32.xlu1 %v717_v61, %s863_s3 }
 0x13e   :  { %733 = vrot.lane.b32.xlu2 %v717_v61, %s862_s0  ;;  %121 = vperm.xlu0 %710, %v115_v17  }
 0x13f   :  { %763 = vrot.lane.b32.xlu1 %v757_v14, %s862_s0 }
 0x146   :  { %753 = vrot.lane.b32.xlu2 %v757_v14, %s866_s2  ;;  %773 = vset.pattern.permute.xlu0 %v867_v1 }
 0x147   :  { %136 = vperm.xlu1 %711, %v118_v18   ;;  %427 = vperm.xlu0 %773, %v934_v15  }
 0x14e   :  { %768 = vrot.lane.b32.xlu2 %v757_v14, %s863_s3 }
 0x14f   :  { %774 = vset.pattern.permute.xlu1 %v867_v1  ;;  %777 = vset.pattern.permute.xlu0 %v868_v19 }
 0x150   :  { %431 = vperm.xlu1 %774, %v939_v16   ;;  %459 = vperm.xlu0 %777, %v939_v16  }
 0x156   :  { %423 = vperm.xlu2 %772, %v115_v17  }
 0x158   :  { %775 = vset.pattern.permute.xlu1 %v868_v19 }
 0x159   :  { %451 = vperm.xlu1 %775, %v115_v17  }
 0x15e   :  { %435 = vperm.xlu2 %772, %v118_v18  }
 0x161   :  { %463 = vperm.xlu1 %775, %v118_v18  }
 0x166   :  { %776 = vset.pattern.permute.xlu2 %v868_v19 }
 0x167   :  { %455 = vperm.xlu2 %776, %v934_v15  }
 0x188   :  { %v724_v20 = vpop.permute.xlu2 %723 }
 0x189   :  { %v726_v21 = vunpack.i.h.bf16 %v724_v20  ;;  %v725_v22 = vunpack.i.l.bf16 %v724_v20  ;;  %v207_v20 = vpop.f32.mrf.mxu1 }
 0x18b   :  { %v341_v23 = vsel %vm338_vm3, %v725_v22, %v726_v21  ;;  %v348_v22 = vld [vmem:[#allocation5 + $0x8] sm:$0xff] }
 0x18c   :  { %370 = vmatpush.msra.mxu3 %v341_v23 }
 0x190   :  { %v729_v24 = vpop.permute.xlu2 %728 }
 0x191   :  { %v731_v27 = vunpack.i.h.bf16 %v729_v24  ;;  %v730_v28 = vunpack.i.l.bf16 %v729_v24 }
 0x193   :  { %v320_v33 = vsel %vm317_vm4, %v730_v28, %v731_v27 }
 0x198   :  { %v1035_v25 = vpop.permute.xlu2 %733  ;;  %v719_v26 = vpop.permute.xlu0 %718 }
 0x199   :  { %v714_v16 = vpop.permute.xlu1 %713  ;;  %v721_v31 = vunpack.i.h.bf16 %v719_v26  ;;  %v720_v32 = vunpack.i.l.bf16 %v719_v26  ;;  %v736_v40 = vunpack.i.h.bf16 %v1035_v25  ;;  %v735_v41 = vunpack.i.l.bf16 %v1035_v25 }
 0x19a   :  { %v716_v29 = vunpack.i.h.bf16 %v714_v16  ;;  %v715_v30 = vunpack.i.l.bf16 %v714_v16 }
 0x19b   :  { %v318_v36 = vsel %vm317_vm4, %v720_v32, %v721_v31  ;;  %v297_v55 = vsel %vm100_vm0, %v735_v41, %v736_v40 }
 0x19c   :  { %v339_v15 = vsel %vm338_vm3, %v715_v30, %v716_v29  ;;  %v349_v30 = vld [vmem:[#allocation5 + $0x10] sm:$0xff] }
 0x19d   :  { %371 = vmatpush.msra.mxu3 %v339_v15 }
 0x19f   :  { %372 = vmatpush.msra.mxu3 %v320_v33 }
 0x1a0   :  { %v754_v34 = vpop.permute.xlu2 %753  ;;  %v1039_v35 = vpop.permute.xlu0 %743 }
 0x1a1   :  { %v756_v37 = vunpack.i.h.bf16 %v754_v34  ;;  %v755_v38 = vunpack.i.l.bf16 %v754_v34  ;;  %v739_v39 = vpop.permute.xlu1 %738  ;;  %373 = vmatpush.msra.mxu3 %v318_v36  ;;  %v746_v49 = vunpack.i.h.bf16 %v1039_v35  ;;  %v745_v50 = vunpack.i.l.bf16 %v1039_v35 }
 0x1a2   :  { %v741_v44 = vunpack.i.h.bf16 %v739_v39  ;;  %v740_v45 = vunpack.i.l.bf16 %v739_v39 }
 0x1a3   :  { %v342_v47 = vsel %vm338_vm3, %v726_v21, %v755_v38  ;;  %v340_v53 = vsel %vm338_vm3, %v716_v29, %v756_v37  ;;  %v279_v59 = vsel %vm77_vm1, %v745_v50, %v746_v49  ;;  %v236_v21 = vpop.f32.mrf.mxu2  ;;  %v350_v29 = vld [vmem:[#allocation5 + $0x18] sm:$0xff] }
 0x1a4   :  { %v299_v51 = vsel %vm100_vm0, %v740_v45, %v741_v44  ;;  %399 = vmatpush.msrb.mxu0 %v342_v47  ;;  %643 = vmatpush.msrb.mxu1 %v342_v47 }
 0x1a5   :  { %374 = vmatpush.msra.mxu3 %v299_v51  ;;  %644 = vmatpush.msrb.mxu2 %v342_v47 }
 0x1a6   :  { %400 = vmatpush.msrb.mxu0 %v340_v53  ;;  %645 = vmatpush.msrb.mxu1 %v340_v53 }
 0x1a7   :  { %375 = vmatpush.msra.mxu3 %v297_v55  ;;  %646 = vmatpush.msrb.mxu2 %v340_v53 }
 0x1a8   :  { %v769_v56 = vpop.permute.xlu2 %768  ;;  %v759_v58 = vpop.permute.xlu0 %758 }
 0x1a9   :  { %v761_v61 = vunpack.i.h.bf16 %v759_v58  ;;  %v760_v62 = vunpack.i.l.bf16 %v759_v58  ;;  %v749_v63 = vpop.permute.xlu1 %748  ;;  %376 = vmatpush.msra.mxu3 %v279_v59  ;;  %v770_v17 = vunpack.i.l.bf16 %v769_v56  ;;  %v771_v19 = vunpack.i.h.bf16 %v769_v56 }
 0x1aa   :  { %v751_v1 = vunpack.i.h.bf16 %v749_v63  ;;  %v750_v3 = vunpack.i.l.bf16 %v749_v63 }
 0x1ab   :  { %v321_v6 = vsel %vm317_vm4, %v731_v27, %v760_v62  ;;  %v319_v9 = vsel %vm317_vm4, %v721_v31, %v761_v61  ;;  %v1088_v31 = vpop.f32.mrf.mxu0 }
 0x1ac   :  { %v277_v8 = vsel %vm77_vm1, %v750_v3, %v751_v1  ;;  %401 = vmatpush.msrb.mxu0 %v321_v6  ;;  %647 = vmatpush.msrb.mxu1 %v321_v6  ;;  %v278_v16 = vsel %vm77_vm1, %v751_v1, %v771_v19 }
 0x1ad   :  { %377 = vmatpush.msra.mxu3 %v277_v8  ;;  %648 = vmatpush.msrb.mxu2 %v321_v6 }
 0x1ae   :  { %402 = vmatpush.msrb.mxu0 %v319_v9  ;;  %649 = vmatpush.msrb.mxu1 %v319_v9 }
 0x1af   :  { %378 = vmatpush.msra.mxu3 %v1005_v2  ;;  %650 = vmatpush.msrb.mxu2 %v319_v9 }
 0x1b0   :  { %v1055_v11 = vpop.permute.xlu2 %423  ;;  %v122_v38 = vpop.permute.xlu0 %121 }
 0x1b1   :  { %v764_v12 = vpop.permute.xlu1 %763  ;;  %379 = vmatpush.msra.mxu3 %v993_v54  ;;  %v280_v54 = vsel %vm77_vm1, %v746_v49, %v770_v17  ;;  %v199_v62 = vadd.f32 %v981_v43, %v122_v38 }
 0x1b2   :  { %v766_v13 = vunpack.i.h.bf16 %v764_v12  ;;  %v765_v14 = vunpack.i.l.bf16 %v764_v12  ;;  %635 = vmatmul.msk.f32.vlgmr.msra.gmra.mxu3 %vm351_vm5, %v347_v10 }
 0x1b3   :  { %v439_v3 = vmul.f32 %v1055_v11, %v199_v62 }
 0x1b4   :  { %v300_v18 = vsel %vm100_vm0, %v741_v44, %v765_v14  ;;  %v298_v2 = vsel %vm100_vm0, %v736_v40, %v766_v13  ;;  %v170_v40 = vadd.f32 %v979_v42, %v122_v38  ;;  %v228_v42 = vadd.f32 %v986_v46, %v122_v38 }
 0x1b5   :  { %403 = vmatpush.msrb.mxu0 %v300_v18  ;;  %651 = vmatpush.msrb.mxu1 %v300_v18 }
 0x1b6   :  { %652 = vmatpush.msrb.mxu2 %v300_v18  ;;  %v438_v44 = vmul.f32 %v1055_v11, %v170_v40  ;;  %v440_v1 = vmul.f32 %v1055_v11, %v228_v42 }
 0x1b7   :  { %404 = vmatpush.msrb.mxu0 %v298_v2  ;;  %653 = vmatpush.msrb.mxu1 %v298_v2 }
 0x1b8   :  { %654 = vmatpush.msrb.mxu2 %v298_v2  ;;  %v1064_v24 = vpop.permute.xlu2 %435 }
 0x1b9   :  { %v1062_v23 = vpop.permute.xlu1 %136  ;;  %405 = vmatpush.msrb.mxu0 %v280_v54  ;;  %655 = vmatpush.msrb.mxu1 %v280_v54  ;;  %v428_v50 = vpop.permute.xlu0 %427 }
 0x1ba   :  { %v208_v25 = vadd.f32 %v207_v20, %v1062_v23  ;;  %v237_v26 = vadd.f32 %v236_v21, %v1062_v23  ;;  %656 = vmatpush.msrb.mxu2 %v280_v54  ;;  %636 = vmatmul.msk.f32.gmra.mxu3 %vm351_vm5, %v348_v22  ;;  %v441_v53 = vmul.f32 %v428_v50, %v988_v48 }
 0x1bb   :  { %406 = vmatpush.msrb.mxu0 %v278_v16  ;;  %657 = vmatpush.msrb.mxu1 %v278_v16  ;;  %v443_v14 = vmul.f32 %v428_v50, %v1008_v4  ;;  %v442_v43 = vmul.f32 %v428_v50, %v991_v52  ;;  %v179_v4 = vadd.f32 %v1088_v31, %v1062_v23 }
 0x1bc   :  { %v1071_v27 = vmul.f32 %v1064_v24, %v208_v25  ;;  %v1074_v28 = vmul.f32 %v1064_v24, %v237_v26  ;;  %658 = vmatpush.msrb.mxu2 %v278_v16 }
 0x1bd   :  { %407 = vmatpush.msrb.mxu0 %v1010_v5  ;;  %659 = vmatpush.msrb.mxu1 %v1010_v5 }
 0x1be   :  { %660 = vmatpush.msrb.mxu2 %v1010_v5 }
 0x1bf   :  { %408 = vmatpush.msrb.mxu0 %v996_v57  ;;  %661 = vmatpush.msrb.mxu1 %v996_v57 }
 0x1c0   :  { %662 = vmatpush.msrb.mxu2 %v996_v57  ;;  %639 = vmatmul.msk.f32.vlgmr.msrb.gmra.mxu0 %vm351_vm5, %v347_v10 }
 0x1c1   :  { %640 = vmatmul.msk.f32.vlgmr.msrb.gmra.mxu1 %vm351_vm5, %v348_v22  ;;  %642 = vmatmul.msk.f32.vlgmr.msrb.gmra.mxu2 %vm351_vm5, %v350_v29  ;;  %v456_v39 = vpop.permute.xlu2 %455 }
 0x1c2   :  { %637 = vmatmul.msk.f32.gmra.mxu3 %vm351_vm5, %v349_v30  ;;  %v432_v37 = vpop.permute.xlu1 %431  ;;  %v469_v55 = vadd.f32 %v456_v39, %v441_v53  ;;  %v460_v63 = vpop.permute.xlu0 %459  ;;  %v471_v19 = vadd.f32 %v456_v39, %v443_v14  ;;  %v470_v2 = vadd.f32 %v456_v39, %v442_v43 }
 0x1c3   :  { %v444_v46 = vmul.f32 %v432_v37, %v998_v60  ;;  %v446_v60 = vmul.f32 %v432_v37, %v1012_v7  ;;  %v445_v52 = vmul.f32 %v432_v37, %v1003_v0 }
 0x1c5   :  { %v472_v20 = vadd.f32 %v460_v63, %v444_v46 }
 0x1c9   :  { %641 = vmatmul.msk.f32.gmra.mxu1 %vm351_vm5, %v349_v30 }
 0x1ca   :  { %638 = vmatmul.msk.f32.gmra.mxu3 %vm351_vm5, %v350_v29 }
 0x1cb   :  { %v452_v41 = vpop.permute.xlu1 %451 }
 0x1cc   :  { %v466_v45 = vadd.f32 %v452_v41, %v438_v44  ;;  %v468_v6 = vadd.f32 %v452_v41, %v440_v1  ;;  %v467_v8 = vadd.f32 %v452_v41, %v439_v3 }
 0x1d3   :  { %v464_v61 = vpop.permute.xlu1 %463 }
 0x1d4   :  { %v476_v39 = vadd.f32 %v464_v61, %v1071_v27 }
 0x235   :  { %v381_v5 = vpop.f32.mrf.mxu3 }
 0x236   :  { %486 = vrot.lane.b32.xlu2 %v381_v5, %s869_s4  ;;  %v447_v5 = vmul.f32 %v1064_v24, %v179_v4  ;;  %v477_v24 = vadd.f32 %v464_v61, %v1074_v28 }
 0x238   :  { %v475_v7 = vadd.f32 %v464_v61, %v447_v5 }
 0x23d   :  { %v384_v32 = vpop.f32.mrf.mxu3  ;;  %v410_v57 = vpop.f32.mrf.mxu0 }
 0x23e   :  { %v413_v15 = vpop.f32.mrf.mxu1  ;;  %488 = vrot.lane.b32.xlu1 %v410_v57, %s869_s4  ;;  %490 = vrot.lane.b32.xlu2 %v384_v32, %s869_s4  ;;  %v474_v32 = vadd.f32 %v460_v63, %v446_v60 }
 0x23f   :  { %492 = vrot.lane.b32.xlu0 %v413_v15, %s869_s4  ;;  %v473_v15 = vadd.f32 %v460_v63, %v445_v52 }
 0x244   :  { %v419_v35 = vpop.f32.mrf.mxu2 }
 0x245   :  { %v387_v33 = vpop.f32.mrf.mxu3 }
 0x246   :  { %v416_v34 = vpop.f32.mrf.mxu1  ;;  %494 = vrot.lane.b32.xlu1 %v387_v33, %s869_s4 }
 0x247   :  { %496 = vrot.lane.b32.xlu2 %v416_v34, %s869_s4 }
 0x24d   :  { %v390_v36 = vpop.f32.mrf.mxu3 }
 0x24e   :  { %500 = vrot.lane.b32.xlu1 %v419_v35, %s869_s4  ;;  %498 = vrot.lane.b32.xlu0 %v390_v36, %s869_s4 }
 0x290   :  { %v487_v47 = vpop.permute.xlu2 %486 }
 0x291   :  { %v519_v49 = vadd.f32 %v487_v47, %v466_v45 }
 0x293   :  { %v531_v51 = vmax.f32 %v519_v49, 0.0 }
 0x295   :  { %555 = vrot.lane.b32.xlu2 %v531_v51, %s862_s0 }
 0x298   :  { %v491_v56 = vpop.permute.xlu2 %490 }
 0x299   :  { %v522_v58 = vadd.f32 %v491_v56, %v469_v55 }
 0x29b   :  { %v534_v59 = vmax.f32 %v522_v58, 0.0 }
 0x29d   :  { %561 = vrot.lane.b32.xlu2 %v534_v59, %s862_s0 }
 0x2a1   :  { %v497_v29 = vpop.permute.xlu2 %496 }
 0x2a2   :  { %v527_v23 = vadd.f32 %v497_v29, %v474_v32 }
 0x2a4   :  { %v539_v35 = vmax.f32 %v527_v23, 0.0 }
 0x2b0   :  { %v489_v48 = vpop.permute.xlu1 %488 }
 0x2b1   :  { %v503_v9 = vsel %vm502_vm6, %v487_v47, %v489_v48  ;;  %v521_v10 = vadd.f32 %v489_v48, %v468_v6  ;;  %v493_v12 = vpop.permute.xlu0 %492 }
 0x2b2   :  { %v520_v13 = vadd.f32 %v503_v9, %v467_v8  ;;  %v504_v11 = vsel %vm502_vm6, %v491_v56, %v493_v12  ;;  %v524_v21 = vadd.f32 %v493_v12, %v471_v19 }
 0x2b3   :  { %v533_v17 = vmax.f32 %v521_v10, 0.0  ;;  %v523_v54 = vadd.f32 %v504_v11, %v470_v2 }
 0x2b4   :  { %v532_v18 = vmax.f32 %v520_v13, 0.0  ;;  %v536_v26 = vmax.f32 %v524_v21, 0.0 }
 0x2b5   :  { %559 = vrot.lane.b32.xlu1 %v533_v17, %s862_s0  ;;  %v535_v30 = vmax.f32 %v523_v54, 0.0 }
 0x2b6   :  { %557 = vrot.lane.b32.xlu0 %v532_v18, %s862_s0 }
 0x2b8   :  { %v495_v22 = vpop.permute.xlu1 %494 }
 0x2b9   :  { %v525_v25 = vadd.f32 %v495_v22, %v472_v20  ;;  %v505_v57 = vsel %vm502_vm6, %v495_v22, %v497_v29 }
 0x2ba   :  { %v526_v31 = vadd.f32 %v505_v57, %v473_v15 }
 0x2bb   :  { %v537_v16 = vmax.f32 %v525_v25, 0.0 }
 0x2bc   :  { %v538_v37 = vmax.f32 %v526_v31, 0.0 }
 0x2bd   :  { %565 = vrot.lane.b32.xlu1 %v536_v26, %s862_s0  ;;  %567 = vrot.lane.b32.xlu2 %v537_v16, %s862_s0 }
 0x2be   :  { %563 = vrot.lane.b32.xlu0 %v535_v30, %s862_s0 }
 0x2c0   :  { %v499_v0 = vpop.permute.xlu0 %498  ;;  %v501_v34 = vpop.permute.xlu1 %500 }
 0x2c1   :  { %v528_v33 = vadd.f32 %v499_v0, %v475_v7  ;;  %v506_v38 = vsel %vm502_vm6, %v499_v0, %v501_v34  ;;  %v530_v40 = vadd.f32 %v501_v34, %v477_v24 }
 0x2c2   :  { %v529_v41 = vadd.f32 %v506_v38, %v476_v39 }
 0x2c3   :  { %v540_v36 = vmax.f32 %v528_v33, 0.0  ;;  %v542_v44 = vmax.f32 %v530_v40, 0.0 }
 0x2c4   :  { %v541_v45 = vmax.f32 %v529_v41, 0.0 }
 0x2c5   :  { %571 = vrot.lane.b32.xlu1 %v539_v35, %s862_s0  ;;  %573 = vrot.lane.b32.xlu2 %v540_v36, %s862_s0 }
 0x2c6   :  { %569 = vrot.lane.b32.xlu0 %v538_v37, %s862_s0 }
 0x2cd   :  { %577 = vrot.lane.b32.xlu1 %v542_v44, %s862_s0 }
 0x2ce   :  { %575 = vrot.lane.b32.xlu0 %v541_v45, %s862_s0 }
 0x2ef   :  { %v556_v47 = vpop.permute.xlu2 %555 }
 0x2f7   :  { %v562_v27 = vpop.permute.xlu2 %561 }
 0x317   :  { %v568_v59 = vpop.permute.xlu2 %567 }
 0x31f   :  { %v574_v3 = vpop.permute.xlu2 %573 }
 0x327   :  { %v560_v28 = vpop.permute.xlu1 %559 }
 0x328   :  { %v558_v49 = vpop.permute.xlu0 %557 }
 0x329   :  { %v579_v50 = vsel %vm100_vm0, %v556_v47, %v558_v49  ;;  %v580_v51 = vsel %vm100_vm0, %v558_v49, %v560_v28 }
 0x32a   :  { %595 = vst [vmem:[#allocation7] sm:$0xff] %v579_v50 }
 0x32b   :  { %596 = vst [vmem:[#allocation7 + $0x8] sm:$0xff] %v580_v51 }
 0x32f   :  { %v566_v53 = vpop.permute.xlu1 %565 }
 0x330   :  { %v564_v55 = vpop.permute.xlu0 %563 }
 0x331   :  { %v581_v56 = vsel %vm100_vm0, %v562_v27, %v564_v55  ;;  %v582_v58 = vsel %vm100_vm0, %v564_v55, %v566_v53 }
 0x332   :  { %597 = vst [vmem:[#allocation7 + $0x10] sm:$0xff] %v581_v56 }
 0x333   :  { %598 = vst [vmem:[#allocation7 + $0x18] sm:$0xff] %v582_v58 }
 0x337   :  { %v572_v61 = vpop.permute.xlu1 %571 }
 0x338   :  { %v570_v42 = vpop.permute.xlu0 %569 }
 0x339   :  { %v583_v62 = vsel %vm100_vm0, %v568_v59, %v570_v42  ;;  %v584_v63 = vsel %vm100_vm0, %v570_v42, %v572_v61 }
 0x33a   :  { %599 = vst [vmem:[#allocation7 + $0x20] sm:$0xff] %v583_v62 }
 0x33b   :  { %600 = vst [vmem:[#allocation7 + $0x28] sm:$0xff] %v584_v63 }
 0x33f   :  { %v578_v1 = vpop.permute.xlu1 %577 }
 0x340   :  { %v576_v6 = vpop.permute.xlu0 %575 }
 0x341   :  { %v585_v8 = vsel %vm100_vm0, %v574_v3, %v576_v6  ;;  %v586_v48 = vsel %vm100_vm0, %v576_v6, %v578_v1 }
 0x342   :  { %601 = vst [vmem:[#allocation7 + $0x30] sm:$0xff] %v585_v8 }
 0x343   :  { %602 = vst [vmem:[#allocation7 + $0x38] sm:$0xff] %v586_v48 }
 0x344   :  { %615 = dma.vmem_to_hbm [thread:$0]  %s608_s26, 1024, %s610_s29, [#allocation4], %s871_s30, %s871_s30, %s872_s6  }
 0x345   :  { %854 = dma.done.wait [#allocation4], 1024  }
 0x346   :  { %855 = vsyncadd [#allocation4], 4294966272 }
 0x347   :  { %620 = vsyncpa [#allocation3], 1 }
 0x348   :  { %621 = vsyncpa [#allocation6], 1 }
 0x349   :  { %622 = vsyncpa [#allocation4], 1 }

</bundles_post_ra>
